<compile_context>
chip_gen: v6e
topology: v6e:2x2x1
jax: 0.10.0
libtpu: 0.0.40
codegen_flags: <defaults>
</compile_context>

<pallas_src>
import jax
import jax.numpy as jnp
from jax.experimental import pallas as pl
from jax.experimental.pallas import tpu as pltpu

_LANE = 128
_SMALL_BATCH = 128           # at/below this, use the single-shot unpadded path
_VMEM_LIMIT_BYTES = 32 * 1024 * 1024   # safe on v5e/v6e (128 MiB phys) and v7x (64 MiB/TC)


def _round_up(x, m):
    return ((x + m - 1) // m) * m


def _sublane_for(dtype):
    # f32 -> 8, bf16 -> 16, int8/fp8 -> 32 (min second-to-last tile dim).
    return max(8, 32 // jnp.dtype(dtype).itemsize)


def _linear_kernel(x_ref, w_ref, b_ref, o_ref):
    """o = x @ w + b   (MXU matmul, f32 accumulation, VPU bias add)."""
    acc = jnp.dot(x_ref[...], w_ref[...], preferred_element_type=jnp.float32)
    o_ref[...] = (acc + b_ref[...]).astype(o_ref.dtype)


def prepare_fc_params(w, b):
    """One-time parameter prep (hoisted out of the per-call path).

    w: [512, 10] (already transposed to in x out), b: [10].
    Returns raw params (small-batch path) plus lane-dense padded params
    (tiled large-batch path).  Padded columns are zero, so numerics match.
    """
    K, N = w.shape
    n_pad = _round_up(max(N, _LANE), _LANE)
    w_pad = jnp.zeros((K, n_pad), dtype=w.dtype).at[:, :N].set(w)
    b_pad = jnp.zeros((1, n_pad), dtype=b.dtype).at[0, :N].set(b)
    return {
        "w": w,                       # [K, N]   unpadded
        "b": b.reshape(1, N),         # [1, N]
        "w_pad": w_pad,               # [K, n_pad]
        "b_pad": b_pad,               # [1, n_pad]
    }


def _fc_small(x, w, b2):
    """Single-shot path for tiny batches: whole arrays in VMEM, unpadded N."""
    B, K = x.shape
    N = w.shape[1]
    return pl.pallas_call(
        _linear_kernel,
        out_shape=jax.ShapeDtypeStruct((B, N), x.dtype),
    )(x, w, b2)


def _fc_tiled(x, w_pad, b_pad, n_out, *, tb_cap, vmem_limit_bytes):
    """Streamed path: batch tiles double-buffered, resident lane-dense weight."""
    B, K = x.shape
    n_pad = w_pad.shape[1]
    sub = _sublane_for(x.dtype)

    # Balance tile size across >= 2 grid steps (feeds both TCs on v7x) without
    # ever padding/copying x; the ragged tail block is handled by Pallas.
    min_tiles = 2 if B >= 2 * sub else 1
    num_tiles = max(pl.cdiv(B, tb_cap), min_tiles)
    tb = _round_up(pl.cdiv(B, num_tiles), sub)
    grid = (pl.cdiv(B, tb),)

    itemsize = jnp.dtype(x.dtype).itemsize
    # Note: flops/bytes reflect the *physical* padded-N work the kernel does.
    cost = pl.CostEstimate(
        flops=2 * B * K * n_pad,
        bytes_accessed=(B * K + K * n_pad + B * n_pad) * itemsize,
        transcendentals=0,
    )

    y_p = pl.pallas_call(
        _linear_kernel,
        out_shape=jax.ShapeDtypeStruct((B, n_pad), x.dtype),
        grid_spec=pltpu.PrefetchScalarGridSpec(
            num_scalar_prefetch=0,
            grid=grid,
            in_specs=[
                pl.BlockSpec((tb, K), lambda i: (i, 0)),      # streamed x tiles
                pl.BlockSpec((K, n_pad), lambda i: (0, 0)),   # resident weight
                pl.BlockSpec((1, n_pad), lambda i: (0, 0)),   # resident bias
            ],
            out_specs=pl.BlockSpec((tb, n_pad), lambda i: (i, 0)),
        ),
        compiler_params=pltpu.CompilerParams(
            dimension_semantics=("parallel",),   # independent batch tiles
            vmem_limit_bytes=vmem_limit_bytes,
        ),
        cost_estimate=cost,
    )(x, w_pad, b_pad)

    # Drop the zero-padded output lanes (no batch padding exists to drop).
    return y_p[:, :n_out]


def fc_forward(x, params, *, tb_cap=2048, vmem_limit_bytes=_VMEM_LIMIT_BYTES):
    """y = x @ w + b  with x: [B, 512] -> [B, 10]."""
    B, K = x.shape
    n_out = params["w"].shape[1]
    assert params["w"].shape[0] == K, (params["w"].shape, K)

    if B <= _SMALL_BATCH:
        return _fc_small(x, params["w"], params["b"])
    return _fc_tiled(x, params["w_pad"], params["b_pad"], n_out,
                     tb_cap=tb_cap, vmem_limit_bytes=vmem_limit_bytes)


if __name__ == "__main__":
    key = jax.random.PRNGKey(0)
    k_x, k_x2, k_w, k_b = jax.random.split(key, 4)

    B, IN, OUT = 2, 512, 10   # nn.Linear(in_features=512, out_features=10)

    # Deterministic synthetic parameters (PyTorch-like uniform init scale).
    bound = 1.0 / jnp.sqrt(IN)
    x = jax.random.normal(k_x, (B, IN), dtype=jnp.float32)
    w = jax.random.uniform(k_w, (IN, OUT), dtype=jnp.float32, minval=-bound, maxval=bound)
    b = jax.random.uniform(k_b, (OUT,), dtype=jnp.float32, minval=-bound, maxval=bound)

    params = prepare_fc_params(w, b)   # one-time padding, hoisted from hot path

    # Small-batch (serving) path.
    y = jax.block_until_ready(fc_forward(x, params))
    y_ref = x @ w + b
    assert y.shape == (B, OUT)
    assert jnp.allclose(y, y_ref, atol=1e-4, rtol=1e-4)

    # Tiled path with a ragged batch (exercises partial tail block + >=2 grid steps).
    B2 = 300
    x2 = jax.random.normal(k_x2, (B2, IN), dtype=jnp.float32)
    y2 = jax.block_until_ready(fc_forward(x2, params))
    y2_ref = x2 @ w + b
    assert y2.shape == (B2, OUT)
    assert jnp.allclose(y2, y2_ref, atol=1e-4, rtol=1e-4)

    print("KERNEL_OK")
</pallas_src>

<mosaic_0001>
module attributes {stable_mosaic.version = 11 : i64} {
  func.func @_linear_kernel(%arg0: memref<2x512xf32, #tpu.memory_space<vmem>>, %arg1: memref<512x10xf32, #tpu.memory_space<vmem>>, %arg2: memref<1x10xf32, #tpu.memory_space<vmem>>, %arg3: memref<2x10xf32, #tpu.memory_space<vmem>>) attributes {dimension_semantics = [], scalar_prefetch = 0 : i64, scratch_operands = 0 : i64, tpu.core_type = #tpu.core_type<tc>} {
    %c0 = arith.constant 0 : index
    %c0_0 = arith.constant 0 : index
    %0 = vector.load %arg0[%c0, %c0_0] : memref<2x512xf32, #tpu.memory_space<vmem>>, vector<2x512xf32>
    %c0_1 = arith.constant 0 : index
    %c0_2 = arith.constant 0 : index
    %1 = vector.load %arg1[%c0_1, %c0_2] : memref<512x10xf32, #tpu.memory_space<vmem>>, vector<512x10xf32>
    %cst = arith.constant dense<0.000000e+00> : vector<2x10xf32>
    %2 = tpu.matmul %0, %1, %cst {dimension_numbers = #tpu.dot_dimension_numbers<[1], [0], [0], [1], [0, 0, 1, 1], [], []>} : vector<2x512xf32>, vector<512x10xf32>, vector<2x10xf32> -> vector<2x10xf32>
    %c0_3 = arith.constant 0 : index
    %c0_4 = arith.constant 0 : index
    %3 = vector.load %arg2[%c0_3, %c0_4] : memref<1x10xf32, #tpu.memory_space<vmem>>, vector<1x10xf32>
    %4 = vector.broadcast %3 : vector<1x10xf32> to vector<2x10xf32>
    %5 = arith.addf %2, %4 : vector<2x10xf32>
    %c0_5 = arith.constant 0 : index
    %c0_6 = arith.constant 0 : index
    %6 = vector.load %arg3[%c0_5, %c0_6] : memref<2x10xf32, #tpu.memory_space<vmem>>, vector<2x10xf32>
    tpu.vector_store %arg3[%c0_5, %c0_6], %5 {strides = array<i32>} : memref<2x10xf32, #tpu.memory_space<vmem>>, vector<2x10xf32>,
    return
  }
}

</mosaic_0001>

<bundles_post_ra>
// kernel: tpu_custom_call.1
= control target key start
LH: loop header
LB: loop body
LE: loop exit
PB: predicated region body
PF: predicated region fallthrough
CT: control target
= control target key end

     0   :  { %v361_v30 = vmov 1983009808   ;;  %v92_v32 = vlaneseq  ;;  %s584_s0 = inlined_call_operand.vmem [shape: f32[2,512], index: 0, kind: input, shape index: {}]   ;;  %s585_s1 = inlined_call_operand.vmem [shape: f32[512,10], index: 1, kind: input, shape index: {}]   ;;  %s586_s2 = inlined_call_operand.vmem [shape: f32[1,10], index: 2, kind: input, shape index: {}]   ;;  %s587_s3 = inlined_call_operand.hbm [shape: f32[2,10], index: 3, kind: output, shape index: {}]  }
   0x1   :  { %v47_v0 = vld [vmem:[%s585_s1 + $0xf8] sm:$0xff]  ;;  %v46_v4 = vld [vmem:[%s585_s1 + $0xf0] sm:$0xff]  ;;  %v45_v8 = vld [vmem:[%s585_s1 + $0xe8] sm:$0xff]  ;;  %v90_v31 = vunpack.c.l.s4 %v361_v30 }
   0x2   :  { %v79_v1 = vld [vmem:[%s585_s1 + $0x1f8] sm:$0xff]  ;;  %266 = vmatprep.subr.mxu0 %v47_v0  ;;  %v78_v5 = vld [vmem:[%s585_s1 + $0x1f0] sm:$0xff]  ;;  %v77_v9 = vld [vmem:[%s585_s1 + $0x1e8] sm:$0xff]  ;;  %v93_v42 = vshrl.u32 %v92_v32, 7 }
   0x3   :  { %v31_v2 = vld [vmem:[%s585_s1 + $0x78] sm:$0xff]  ;;  %301 = vmatprep.subr.mxu1 %v79_v1  ;;  %v30_v6 = vld [vmem:[%s585_s1 + $0x70] sm:$0xff]  ;;  %v29_v10 = vld [vmem:[%s585_s1 + $0x68] sm:$0xff]  ;;  %v91_v41 = vunpack.c.0.s8 %v90_v31 }
   0x4   :  { %v63_v3 = vld [vmem:[%s585_s1 + $0x178] sm:$0xff]  ;;  %267 = vmatpush3.msra.mxu0 %v31_v2  ;;  %v62_v7 = vld [vmem:[%s585_s1 + $0x170] sm:$0xff]  ;;  %v61_v11 = vld [vmem:[%s585_s1 + $0x168] sm:$0xff] }
   0x5   :  { %302 = vmatpush3.msra.mxu1 %v63_v3  ;;  %268 = vmatprep.subr.mxu0 %v46_v4  ;;  %v44_v12 = vld [vmem:[%s585_s1 + $0xe0] sm:$0xff]  ;;  %v43_v16 = vld [vmem:[%s585_s1 + $0xd8] sm:$0xff]  ;;  %v42_v20 = vld [vmem:[%s585_s1 + $0xd0] sm:$0xff]  ;;  %v94_v52 = vsub.s32 %v91_v41, %v93_v42 }
   0x6   :  { %303 = vmatprep.subr.mxu1 %v78_v5  ;;  %269 = vmatpush3.msra.mxu0 %v30_v6  ;;  %v76_v13 = vld [vmem:[%s585_s1 + $0x1e0] sm:$0xff]  ;;  %v75_v17 = vld [vmem:[%s585_s1 + $0x1d8] sm:$0xff]  ;;  %v74_v21 = vld [vmem:[%s585_s1 + $0x1d0] sm:$0xff] }
   0x7   :  { %304 = vmatpush3.msra.mxu1 %v62_v7  ;;  %270 = vmatprep.subr.mxu0 %v45_v8  ;;  %v28_v14 = vld [vmem:[%s585_s1 + $0x60] sm:$0xff]  ;;  %v27_v18 = vld [vmem:[%s585_s1 + $0x58] sm:$0xff]  ;;  %v26_v22 = vld [vmem:[%s585_s1 + $0x50] sm:$0xff] }
   0x8   :  { %305 = vmatprep.subr.mxu1 %v77_v9  ;;  %v60_v15 = vld [vmem:[%s585_s1 + $0x160] sm:$0xff]  ;;  %271 = vmatpush3.msra.mxu0 %v29_v10  ;;  %v59_v19 = vld [vmem:[%s585_s1 + $0x158] sm:$0xff]  ;;  %v58_v23 = vld [vmem:[%s585_s1 + $0x150] sm:$0xff] }
   0x9   :  { %306 = vmatpush3.msra.mxu1 %v61_v11  ;;  %272 = vmatprep.subr.mxu0 %v44_v12  ;;  %v41_v24 = vld [vmem:[%s585_s1 + $0xc8] sm:$0xff]  ;;  %v40_v28 = vld [vmem:[%s585_s1 + $0xc0] sm:$0xff]  ;;  %v39_v35 = vld [vmem:[%s585_s1 + $0xb8] sm:$0xff] }
   0xa   :  { %307 = vmatprep.subr.mxu1 %v76_v13  ;;  %273 = vmatpush3.msra.mxu0 %v28_v14  ;;  %v73_v25 = vld [vmem:[%s585_s1 + $0x1c8] sm:$0xff]  ;;  %v72_v29 = vld [vmem:[%s585_s1 + $0x1c0] sm:$0xff]  ;;  %v71_v36 = vld [vmem:[%s585_s1 + $0x1b8] sm:$0xff] }
   0xb   :  { %308 = vmatpush3.msra.mxu1 %v60_v15  ;;  %274 = vmatprep.subr.mxu0 %v43_v16  ;;  %v25_v26 = vld [vmem:[%s585_s1 + $0x48] sm:$0xff]  ;;  %v24_v33 = vld [vmem:[%s585_s1 + $0x40] sm:$0xff]  ;;  %v23_v37 = vld [vmem:[%s585_s1 + $0x38] sm:$0xff] }
   0xc   :  { %309 = vmatprep.subr.mxu1 %v75_v17  ;;  %275 = vmatpush3.msra.mxu0 %v27_v18  ;;  %v57_v27 = vld [vmem:[%s585_s1 + $0x148] sm:$0xff]  ;;  %v56_v34 = vld [vmem:[%s585_s1 + $0x140] sm:$0xff]  ;;  %v55_v38 = vld [vmem:[%s585_s1 + $0x138] sm:$0xff] }
   0xd   :  { %310 = vmatpush3.msra.mxu1 %v59_v19  ;;  %276 = vmatprep.subr.mxu0 %v42_v20  ;;  %v38_v39 = vld [vmem:[%s585_s1 + $0xb0] sm:$0xff]  ;;  %v37_v45 = vld [vmem:[%s585_s1 + $0xa8] sm:$0xff]  ;;  %v36_v49 = vld [vmem:[%s585_s1 + $0xa0] sm:$0xff] }
   0xe   :  { %311 = vmatprep.subr.mxu1 %v74_v21  ;;  %277 = vmatpush3.msra.mxu0 %v26_v22  ;;  %v70_v40 = vld [vmem:[%s585_s1 + $0x1b0] sm:$0xff]  ;;  %v69_v46 = vld [vmem:[%s585_s1 + $0x1a8] sm:$0xff]  ;;  %v68_v50 = vld [vmem:[%s585_s1 + $0x1a0] sm:$0xff] }
   0xf   :  { %312 = vmatpush3.msra.mxu1 %v58_v23  ;;  %278 = vmatprep.subr.mxu0 %v41_v24  ;;  %v22_v43 = vld [vmem:[%s585_s1 + $0x30] sm:$0xff]  ;;  %v21_v47 = vld [vmem:[%s585_s1 + $0x28] sm:$0xff]  ;;  %v20_v51 = vld [vmem:[%s585_s1 + $0x20] sm:$0xff] }
  0x10   :  { %313 = vmatprep.subr.mxu1 %v73_v25  ;;  %279 = vmatpush3.msra.mxu0 %v25_v26  ;;  %v54_v44 = vld [vmem:[%s585_s1 + $0x130] sm:$0xff]  ;;  %v53_v48 = vld [vmem:[%s585_s1 + $0x128] sm:$0xff]  ;;  %v52_v53 = vld [vmem:[%s585_s1 + $0x120] sm:$0xff] }
  0x11   :  { %314 = vmatpush3.msra.mxu1 %v57_v27  ;;  %280 = vmatprep.subr.mxu0 %v40_v28  ;;  %v15_v54 = vld [vmem:[%s584_s0] sm:$0xff] }
  0x12   :  { %315 = vmatprep.subr.mxu1 %v72_v29  ;;  %281 = vmatpush3.msra.mxu0 %v24_v33 }
  0x13   :  { %316 = vmatpush3.msra.mxu1 %v56_v34  ;;  %282 = vmatprep.subr.mxu0 %v39_v35 }
  0x14   :  { %317 = vmatprep.subr.mxu1 %v71_v36  ;;  %283 = vmatpush3.msra.mxu0 %v23_v37 }
  0x15   :  { %318 = vmatpush3.msra.mxu1 %v55_v38  ;;  %284 = vmatprep.subr.mxu0 %v38_v39 }
  0x16   :  { %319 = vmatprep.subr.mxu1 %v70_v40  ;;  %285 = vmatpush3.msra.mxu0 %v22_v43 }
  0x17   :  { %320 = vmatpush3.msra.mxu1 %v54_v44  ;;  %286 = vmatprep.subr.mxu0 %v37_v45 }
  0x18   :  { %321 = vmatprep.subr.mxu1 %v69_v46 }
  0x19   :  { %8 = vsyncpa [#allocation3], 0  ;;  %287 = vmatpush3.msra.mxu0 %v21_v47  ;;  %322 = vmatpush3.msra.mxu1 %v53_v48  ;;  %v35_v55 = vld [vmem:[%s585_s1 + $0x98] sm:$0xff]  ;;  %v88_v57 = vcombine.high %v15_v54, %v15_v54  ;;  %v34_v60 = vld [vmem:[%s585_s1 + $0x90] sm:$0xff]  ;;  %v95_v62 = vrot.slane %v15_v54, %v94_v52  ;;  %s362_s8 = smov [#allocation2]   ;;  %vm249_vm0 = vcmask 74752  }
  0x1a   :  { %v67_v56 = vld [vmem:[%s585_s1 + $0x198] sm:$0xff]  ;;  %288 = vmatprep.subr.mxu0 %v36_v49  ;;  %323 = vmatprep.subr.mxu1 %v68_v50  ;;  %v66_v61 = vld [vmem:[%s585_s1 + $0x190] sm:$0xff]  ;;  %v33_v2 = vld [vmem:[%s585_s1 + $0x88] sm:$0xff]  ;;  %s257_s0 = sshll.u32 %s362_s8, 4  ;;  %s258_s0 = int_to_ptr.vmem [resolvable:$true] %s257_s0 }
  0x1b   :  { %v19_v58 = vld [vmem:[%s585_s1 + $0x18] sm:$0xff]  ;;  %289 = vmatpush3.msra.mxu0 %v20_v51  ;;  %324 = vmatpush3.msra.mxu1 %v52_v53  ;;  %v18_v63 = vld [vmem:[%s585_s1 + $0x10] sm:$0xff]  ;;  %v102_v1 = vrot.slane %v88_v57, %v94_v52  ;;  %v65_v3 = vld [vmem:[%s585_s1 + $0x188] sm:$0xff]  ;;  %v103_v8 = vcombine.high %v95_v62, %v95_v62  ;;  %p344_p1 = scmp.lt.s32.totalorder %s258_s0, %s258_s0 }
  0x1c   :  { %v51_v59 = vld [vmem:[%s585_s1 + $0x118] sm:$0xff]  ;;  %290 = vmatprep.subr.mxu0 %v35_v55  ;;  %325 = vmatprep.subr.mxu1 %v67_v56  ;;  %v50_v0 = vld [vmem:[%s585_s1 + $0x110] sm:$0xff]  ;;  %v17_v4 = vld [vmem:[%s585_s1 + $0x8] sm:$0xff] }
  0x1d   :  { %291 = vmatpush3.msra.mxu0 %v19_v58  ;;  %326 = vmatpush3.msra.mxu1 %v51_v59  ;;  %v49_v5 = vld [vmem:[%s585_s1 + $0x108] sm:$0xff]  ;;  %v32_v6 = vld [vmem:[%s585_s1 + $0x80] sm:$0xff]  ;;  %v104_v10 = vcombine.high %v102_v1, %v102_v1 }
  0x1e   :  { %292 = vmatprep.subr.mxu0 %v34_v60  ;;  %327 = vmatprep.subr.mxu1 %v66_v61  ;;  %v64_v7 = vld [vmem:[%s585_s1 + $0x180] sm:$0xff] }
  0x1f   :  { %293 = vmatpush3.msra.mxu0 %v18_v63  ;;  %328 = vmatpush3.msra.mxu1 %v50_v0  ;;  %v16_v9 = vld [vmem:[%s585_s1] sm:$0xff] }
  0x20   :  { %294 = vmatprep.subr.mxu0 %v33_v2  ;;  %329 = vmatprep.subr.mxu1 %v65_v3  ;;  %v48_v11 = vld [vmem:[%s585_s1 + $0x100] sm:$0xff]  ;;  %s339_s1 = scalar_lea.vmem %s258_s0, 32 }
  0x21   :  { %295 = vmatpush3.msra.mxu0 %v17_v4  ;;  %330 = vmatpush3.msra.mxu1 %v49_v5  ;;  %v265_v14 = vld [vmem:[%s586_s2] ss:$0 sm:$0xff]  ;;  %p340_p0 = scmp.ne.s32.totalorder %s258_s0, %s339_s1  ;;  %p345_p2 = scmp.lt.s32.totalorder %s339_s1, %s339_s1 }
  0x22   :  { %296 = vmatprep.subr.mxu0 %v32_v6  ;;  %331 = vmatprep.subr.mxu1 %v64_v7 }
  0x23   :  { %297 = vmatpush3.msra.mxu0 %v16_v9  ;;  %173 = vmatprep.mubr.f32.mxu0 %v103_v8  ;;  %p346_p3 = por %p345_p2, %p344_p1 }
  0x24   :  { %332 = vmatpush3.msra.mxu1 %v48_v11  ;;  %243 = vmatprep.mubr.f32.mxu1 %v104_v10 }
  0x25   :  { %174 = vmatmul.mubr.f32.vlgmr.msra.gmra.mxu0 %v95_v62  ;;  %244 = vmatmul.mubr.f32.vlgmr.msra.gmra.mxu1 %v102_v1  ;;  %p347_p4 = pnand %p346_p3, %p340_p0 }
  0xe5   :  { %v298_v12 = vpop.f32.mrf.mxu0  ;;  %v333_v13 = vpop.f32.mrf.mxu1 }
  0xe7   :  { %v299_v15 = vpop.f32.mrf.mxu0  ;;  %v334_v16 = vpop.f32.mrf.mxu1 }
  0xe8   :  { %v300_v17 = vadd.f32 %v299_v15, %v298_v12  ;;  %v335_v19 = vadd.f32 %v334_v16, %v333_v13 }
  0xea   :  { %v176_v18 = vadd.f32 %v300_v17, %v265_v14 }
  0xec   :  { %v246_v20 = vadd.f32 %v335_v19, %v176_v18 }
  0xee   :  { %250 = vst.msk [vmem:[#allocation2] sm:$0x3] %vm249_vm0, %v246_v20 }
  0xef   :  { %350 = shalt.err (!%p347_p4)
}
  0xf0   :  { %260 = dma.vmem_to_hbm [thread:$0]  %s258_s0, 32, %s587_s3, [#allocation3]  }
  0xf1   :  { %359 = dma.done.wait [#allocation3], 32  }
  0xf2   :  { %360 = vsyncadd [#allocation3], 4294967264 }
  0xf3   :  { %264 = vsyncpa [#allocation3], 1 }

</bundles_post_ra>
